<compile_context>
chip_gen: v7x
topology: tpu7x:2x2x1
jax: 0.10.0
libtpu: 0.0.40
codegen_flags: <defaults>
</compile_context>

<pallas_src>
import functools

import numpy as np

import jax
import jax.numpy as jnp
from jax.experimental import pallas as pl
from jax.experimental.pallas import tpu as pltpu


# ----------------------------- helpers --------------------------------------

def _round_up(a, b):
    return (a + b - 1) // b * b


def _next_pow2(x):
    return 1 << (int(x) - 1).bit_length() if x > 1 else 1


def _pack_conv_banks(conv_weights, conv_biases, widths, max_chars, n_pos):
    """Packs all conv banks into one block-Toeplitz RHS + one additive array.

    conv_weights[i] : (width_i, D, num_i)   (Conv1d weight, reindexed)
    conv_biases[i]  : (1, num_i)

    Returns:
      w_big : (L*D, n_pos*F) float32 — column (p*F + f) holds the taps of
              filter f shifted to start at char position p (zero elsewhere).
      add   : (1, n_pos*F)   float32 — bias at valid positions, -1e30 at
              positions where the filter would run past the end of the word.
    """
    D = int(conv_weights[0].shape[1])
    F = sum(int(w.shape[2]) for w in conv_weights)
    w_big = np.zeros((max_chars * D, n_pos * F), dtype=np.float32)
    add = np.full((1, n_pos * F), -1e30, dtype=np.float32)
    f0 = 0
    for w, b, width in zip(conv_weights, conv_biases, widths):
        w = np.asarray(w, dtype=np.float32)                 # (width, D, num)
        b = np.asarray(b, dtype=np.float32).reshape(-1)     # (num,)
        num = w.shape[2]
        l_out = max_chars - width + 1
        for p in range(l_out):
            cols = slice(p * F + f0, p * F + f0 + num)
            for k in range(width):
                rows = slice((p + k) * D, (p + k + 1) * D)
                w_big[rows, cols] = w[k]
            add[0, cols] = b
        f0 += num
    return w_big, add


# ----------------------------- kernel ---------------------------------------

def _cnn_embed_kernel(x_ref, w_ref, add_ref, pw_ref, pb_ref, out_ref, *,
                      n_filters):
    # x: (TN, L*D) bf16   w: (L*D, n_pos*F) bf16
    x = x_ref[...]
    conv = jnp.dot(x, w_ref[...], preferred_element_type=jnp.float32)
    conv = conv + add_ref[...]            # bias at valid pos, -1e30 at invalid

    # Max over positions: columns are laid out (position-major, filter-minor),
    # n_pos is a power of two, so a log-tree of lane-halving maxima reduces
    # (TN, n_pos*F) -> (TN, F) without any sublane relayout.
    m = conv
    width = m.shape[1]
    while width > n_filters:
        half = width // 2
        m = jnp.maximum(m[:, :half], m[:, half:width])
        width = half

    feat = jnp.maximum(m, 0.0)            # ReLU, (TN, F) f32

    out = jnp.dot(feat, pw_ref[...], preferred_element_type=jnp.float32)
    out = out + pb_ref[...]
    out_ref[...] = out.astype(out_ref.dtype)


# ----------------------------- wrapper --------------------------------------

def cnn_embedder_pallas(char_emb, conv_weights, conv_biases, widths,
                        proj_w, proj_b, *, max_tile_n=2048,
                        compute_dtype=jnp.bfloat16):
    """char_emb: (N, L, D); returns (N, proj_dim) float32."""
    n, max_chars, char_dim = char_emb.shape
    n_filters = sum(int(w.shape[2]) for w in conv_weights)
    proj_dim = int(proj_w.shape[1])
    n_pos = _next_pow2(max_chars)
    ld = max_chars * char_dim
    nc = n_pos * n_filters

    # Pack conv banks once (host-side setup).
    w_big_np, add_np = _pack_conv_banks(conv_weights, conv_biases, widths,
                                        max_chars, n_pos)
    w_big = jnp.asarray(w_big_np, dtype=compute_dtype)
    add_big = jnp.asarray(add_np, dtype=jnp.float32)
    pw = jnp.asarray(proj_w, dtype=jnp.float32)
    pb = jnp.asarray(proj_b, dtype=jnp.float32).reshape(1, proj_dim)

    # Lane-dense input slab; pad N so any tile_n works (no divisor constraint).
    x = char_emb.reshape(n, ld).astype(compute_dtype)
    tile_n = min(max_tile_n, _round_up(n, 8))
    n_pad = _round_up(n, tile_n)
    if n_pad != n:
        x = jnp.pad(x, ((0, n_pad - n), (0, 0)))

    kernel = functools.partial(_cnn_embed_kernel, n_filters=n_filters)

    out = pl.pallas_call(
        kernel,
        out_shape=jax.ShapeDtypeStruct((n_pad, proj_dim), jnp.float32),
        grid_spec=pltpu.PrefetchScalarGridSpec(
            num_scalar_prefetch=0,
            grid=(n_pad // tile_n,),
            in_specs=[
                pl.BlockSpec((tile_n, ld), lambda i: (i, 0)),
                pl.BlockSpec((ld, nc), lambda i: (0, 0)),
                pl.BlockSpec((1, nc), lambda i: (0, 0)),
                pl.BlockSpec((n_filters, proj_dim), lambda i: (0, 0)),
                pl.BlockSpec((1, proj_dim), lambda i: (0, 0)),
            ],
            out_specs=pl.BlockSpec((tile_n, proj_dim), lambda i: (i, 0)),
        ),
        compiler_params=pltpu.CompilerParams(
            dimension_semantics=("parallel",)),
    )(x, w_big, add_big, pw, pb)

    return out[:n]


# ----------------------------- reference ------------------------------------

def cnn_embedder_reference(char_emb, conv_weights, conv_biases, widths,
                           proj_w, proj_b):
    """Pure-JAX mirror of the PyTorch forward (conv -> max -> relu -> proj)."""
    feats = []
    max_chars = char_emb.shape[1]
    for w, b, width in zip(conv_weights, conv_biases, widths):
        l_out = max_chars - width + 1
        conv = sum(
            jnp.einsum("nld,df->nlf", char_emb[:, k:k + l_out, :], w[k])
            for k in range(width)
        ) + b
        feats.append(jnp.maximum(jnp.max(conv, axis=1), 0.0))
    feat = jnp.concatenate(feats, axis=-1)
    return feat @ proj_w + proj_b


# ----------------------------- main -----------------------------------------

if __name__ == "__main__":
    # Hyperparameters implied by the module (small demo shapes).
    batch_size = 2
    seq_len = 8
    max_chars = 8
    char_dim = 16
    filters = [(1, 8), (2, 8), (3, 16)]      # (width, num)
    widths = [w for w, _ in filters]
    n_filters = sum(num for _, num in filters)   # 32
    projection_dim = 32
    num_vocab = 20
    # TODO(synk): char_file vocabulary loading (file I/O) replaced by a
    # synthetic lexicon; 'tanh' activation branch not exercised (relu used).

    key = jax.random.PRNGKey(0)
    k_emb, k_ids, k_pw, k_pb, *k_convs = jax.random.split(key, 4 + len(filters))

    # CharEmbed: uniform(-0.25, 0.25) then row-L2-normalize (normalize=True).
    emb_weight = jax.random.uniform(
        k_emb, (num_vocab, char_dim), minval=-0.25, maxval=0.25,
        dtype=jnp.float32)
    emb_weight = emb_weight / jnp.linalg.norm(emb_weight, axis=1,
                                              keepdims=True)
    # Keep values bf16-representable (kernel runs MXU in bf16).
    emb_weight = emb_weight.astype(jnp.bfloat16).astype(jnp.float32)

    # Conv1d params stored as (width, char_dim, num) — same math as PyTorch's
    # (num, char_dim, width), reindexed. Weights rounded to bf16 grid.
    conv_weights, conv_biases = [], []
    for i, (width, num) in enumerate(filters):
        kw, kb = jax.random.split(k_convs[i])
        w = jax.random.uniform(kw, (width, char_dim, num),
                               minval=-0.1, maxval=0.1, dtype=jnp.float32)
        b = jax.random.uniform(kb, (1, num),
                               minval=-0.1, maxval=0.1, dtype=jnp.float32)
        conv_weights.append(w.astype(jnp.bfloat16).astype(jnp.float32))
        conv_biases.append(b)

    # Projection Linear(n_filters -> projection_dim), stored as (in, out).
    proj_w = jax.random.uniform(k_pw, (n_filters, projection_dim),
                                minval=-0.1, maxval=0.1, dtype=jnp.float32)
    proj_b = jax.random.uniform(k_pb, (1, projection_dim),
                                minval=-0.1, maxval=0.1, dtype=jnp.float32)

    # Input: character ids (batch, seq_len, max_chars).
    chars_inp = jax.random.randint(
        k_ids, (batch_size, seq_len, max_chars), 0, num_vocab,
        dtype=jnp.int32)

    # Glue: flatten (B*S, max_chars), embedding gather -> (N, L, D).
    n_tokens = batch_size * seq_len
    ids_flat = chars_inp.reshape(n_tokens, max_chars)
    char_emb = emb_weight[ids_flat]          # (N, max_chars, char_dim) f32

    # Pallas kernel: fused conv banks + max-pool + ReLU + projection.
    out_flat = cnn_embedder_pallas(
        char_emb, conv_weights, conv_biases, widths, proj_w, proj_b)
    out = out_flat.reshape(batch_size, seq_len, projection_dim)
    out = jax.block_until_ready(out)

    # Correctness check against a pure-JAX reference.
    ref = cnn_embedder_reference(
        char_emb, conv_weights, conv_biases, widths, proj_w, proj_b
    ).reshape(batch_size, seq_len, projection_dim)
    assert out.shape == (batch_size, seq_len, projection_dim)
    assert jnp.allclose(out, ref, atol=1e-3, rtol=1e-3), "mismatch vs reference"

    print("KERNEL_OK")
</pallas_src>

<mosaic_0001>
module attributes {stable_mosaic.version = 11 : i64} {
  func.func @_cnn_embed_kernel(%arg0: i32, %arg1: memref<16x128xbf16, #tpu.memory_space<vmem>>, %arg2: memref<128x256xbf16, #tpu.memory_space<vmem>>, %arg3: memref<1x256xf32, #tpu.memory_space<vmem>>, %arg4: memref<32x32xf32, #tpu.memory_space<vmem>>, %arg5: memref<1x32xf32, #tpu.memory_space<vmem>>, %arg6: memref<16x32xf32, #tpu.memory_space<vmem>>) attributes {dimension_semantics = [#tpu.dimension_semantics<parallel>], iteration_bounds = array<i64: 1>, scalar_prefetch = 0 : i64, scratch_operands = 0 : i64, tpu.core_type = #tpu.core_type<tc>, window_params = [{transform_indices = @transform_0, window_bounds = array<i64: 16, 128>}, {pipeline_mode = #tpu.pipeline_mode<synchronous>, transform_indices = @transform_1, window_bounds = array<i64: 128, 256>}, {pipeline_mode = #tpu.pipeline_mode<synchronous>, transform_indices = @transform_2, window_bounds = array<i64: 1, 256>}, {pipeline_mode = #tpu.pipeline_mode<synchronous>, transform_indices = @transform_3, window_bounds = array<i64: 32, 32>}, {pipeline_mode = #tpu.pipeline_mode<synchronous>, transform_indices = @transform_4, window_bounds = array<i64: 1, 32>}, {transform_indices = @transform_5, window_bounds = array<i64: 16, 32>}]} {
    %c0 = arith.constant 0 : index
    %c0_0 = arith.constant 0 : index
    %0 = vector.load %arg1[%c0, %c0_0] : memref<16x128xbf16, #tpu.memory_space<vmem>>, vector<16x128xbf16>
    %c0_1 = arith.constant 0 : index
    %c0_2 = arith.constant 0 : index
    %1 = vector.load %arg2[%c0_1, %c0_2] : memref<128x256xbf16, #tpu.memory_space<vmem>>, vector<128x256xbf16>
    %cst = arith.constant dense<0.000000e+00> : vector<16x256xf32>
    %2 = tpu.matmul %0, %1, %cst {dimension_numbers = #tpu.dot_dimension_numbers<[1], [0], [0], [1], [0, 0, 1, 1], [], []>} : vector<16x128xbf16>, vector<128x256xbf16>, vector<16x256xf32> -> vector<16x256xf32>
    %c0_3 = arith.constant 0 : index
    %c0_4 = arith.constant 0 : index
    %3 = vector.load %arg3[%c0_3, %c0_4] : memref<1x256xf32, #tpu.memory_space<vmem>>, vector<1x256xf32>
    %4 = vector.broadcast %3 : vector<1x256xf32> to vector<16x256xf32>
    %5 = arith.addf %2, %4 : vector<16x256xf32>
    %6 = vector.extract_strided_slice %5 {offsets = [0, 0], sizes = [16, 128], strides = [1, 1]} : vector<16x256xf32> to vector<16x128xf32>
    %7 = vector.extract_strided_slice %5 {offsets = [0, 128], sizes = [16, 128], strides = [1, 1]} : vector<16x256xf32> to vector<16x128xf32>
    %8 = arith.maximumf %6, %7 : vector<16x128xf32>
    %9 = vector.extract_strided_slice %8 {offsets = [0, 0], sizes = [16, 64], strides = [1, 1]} : vector<16x128xf32> to vector<16x64xf32>
    %10 = vector.extract_strided_slice %8 {offsets = [0, 64], sizes = [16, 64], strides = [1, 1]} : vector<16x128xf32> to vector<16x64xf32>
    %11 = arith.maximumf %9, %10 : vector<16x64xf32>
    %12 = vector.extract_strided_slice %11 {offsets = [0, 0], sizes = [16, 32], strides = [1, 1]} : vector<16x64xf32> to vector<16x32xf32>
    %13 = vector.extract_strided_slice %11 {offsets = [0, 32], sizes = [16, 32], strides = [1, 1]} : vector<16x64xf32> to vector<16x32xf32>
    %14 = arith.maximumf %12, %13 : vector<16x32xf32>
    %cst_5 = arith.constant 0.000000e+00 : f32
    %15 = vector.broadcast %cst_5 : f32 to vector<16x32xf32>
    %16 = arith.maximumf %14, %15 : vector<16x32xf32>
    %c0_6 = arith.constant 0 : index
    %c0_7 = arith.constant 0 : index
    %17 = vector.load %arg4[%c0_6, %c0_7] : memref<32x32xf32, #tpu.memory_space<vmem>>, vector<32x32xf32>
    %cst_8 = arith.constant dense<0.000000e+00> : vector<16x32xf32>
    %18 = tpu.matmul %16, %17, %cst_8 {dimension_numbers = #tpu.dot_dimension_numbers<[1], [0], [0], [1], [0, 0, 1, 1], [], []>} : vector<16x32xf32>, vector<32x32xf32>, vector<16x32xf32> -> vector<16x32xf32>
    %c0_9 = arith.constant 0 : index
    %c0_10 = arith.constant 0 : index
    %19 = vector.load %arg5[%c0_9, %c0_10] : memref<1x32xf32, #tpu.memory_space<vmem>>, vector<1x32xf32>
    %20 = vector.broadcast %19 : vector<1x32xf32> to vector<16x32xf32>
    %21 = arith.addf %18, %20 : vector<16x32xf32>
    %c0_11 = arith.constant 0 : index
    %c0_12 = arith.constant 0 : index
    %22 = vector.load %arg6[%c0_11, %c0_12] : memref<16x32xf32, #tpu.memory_space<vmem>>, vector<16x32xf32>
    tpu.vector_store %arg6[%c0_11, %c0_12], %21 {strides = array<i32>} : memref<16x32xf32, #tpu.memory_space<vmem>>, vector<16x32xf32>,
    return
  }
  func.func @transform_0(%arg0: i32) -> (i32, i32) {
    %c0_i32 = arith.constant 0 : i32
    %c0_i32_0 = arith.constant 0 : i32
    return %arg0, %c0_i32 : i32, i32
  }
  func.func @transform_1(%arg0: i32) -> (i32, i32) {
    %c0_i32 = arith.constant 0 : i32
    %c0_i32_0 = arith.constant 0 : i32
    %c0_i32_1 = arith.constant 0 : i32
    return %c0_i32, %c0_i32_0 : i32, i32
  }
  func.func @transform_2(%arg0: i32) -> (i32, i32) {
    %c0_i32 = arith.constant 0 : i32
    %c0_i32_0 = arith.constant 0 : i32
    %c0_i32_1 = arith.constant 0 : i32
    return %c0_i32, %c0_i32_0 : i32, i32
  }
  func.func @transform_3(%arg0: i32) -> (i32, i32) {
    %c0_i32 = arith.constant 0 : i32
    %c0_i32_0 = arith.constant 0 : i32
    %c0_i32_1 = arith.constant 0 : i32
    return %c0_i32, %c0_i32_0 : i32, i32
  }
  func.func @transform_4(%arg0: i32) -> (i32, i32) {
    %c0_i32 = arith.constant 0 : i32
    %c0_i32_0 = arith.constant 0 : i32
    %c0_i32_1 = arith.constant 0 : i32
    return %c0_i32, %c0_i32_0 : i32, i32
  }
  func.func @transform_5(%arg0: i32) -> (i32, i32) {
    %c0_i32 = arith.constant 0 : i32
    %c0_i32_0 = arith.constant 0 : i32
    return %arg0, %c0_i32 : i32, i32
  }
}

</mosaic_0001>

<bundles_post_ra>
// kernel: tpu_custom_call.1
= control target key start
LH: loop header
LB: loop body
LE: loop exit
PB: predicated region body
PF: predicated region fallthrough
CT: control target
= control target key end

     0   :  { %10 = vsyncpa [#allocation3], 0  ;;  %s644_s0 = inlined_call_operand.hbm [shape: bf16[16,128], index: 0, kind: input, shape index: {}]   ;;  %s645_s1 = inlined_call_operand.hbm [shape: bf16[128,256], index: 1, kind: input, shape index: {}]   ;;  %s646_s2 = inlined_call_operand.vmem [shape: f32[1,256], index: 2, kind: input, shape index: {}]   ;;  %s647_s3 = inlined_call_operand.hbm [shape: f32[32,32], index: 3, kind: input, shape index: {}]   ;;  %s648_s4 = inlined_call_operand.vmem [shape: f32[1,32], index: 4, kind: input, shape index: {}]   ;;  %s649_s5 = inlined_call_operand.hbm [shape: f32[16,32], index: 5, kind: output, shape index: {}]  }
   0x1   :  { %11 = vsyncpa [#allocation6], 0 }
   0x2   :  { %12 = vsyncpa [#allocation4], 0  ;;  %s533_s18 = smov [#allocation5]   ;;  %s439_s22 = scalar_lea.hbm %s645_s1, 2048 }
   0x3   :  { %s30_s19 = sshll.u32 %s533_s18, 4  ;;  %p440_p0 = scmp.ne.s32.totalorder %s645_s1, %s439_s22  ;;  %s31_s19 = int_to_ptr.vmem [resolvable:$true] %s30_s19 }
   0x4   :  { %p443_p1 = scmp.lt.u32.totalorder %s439_s22, %s645_s1 }
   0x6   :  { %p445_p2 = pnand %p443_p1, %p440_p0 }
   0x8   :  { %448 = shalt.err (!%p445_p2)
}
   0x9   :  { %s449_s27 = scalar_lea.vmem %s31_s19, 2048  ;;  %p454_p4 = scmp.lt.s32.totalorder %s31_s19, %s31_s19 }
   0xa   :  { %p450_p3 = scmp.ne.s32.totalorder %s31_s19, %s449_s27  ;;  %p455_p5 = scmp.lt.s32.totalorder %s449_s27, %s449_s27 }
   0xc   :  { %p456_p6 = por %p455_p5, %p454_p4 }
   0xe   :  { %p457_p7 = pnand %p456_p6, %p450_p3 }
  0x10   :  { %460 = shalt.err (!%p457_p7)
}
  0x11   :  { %s534_s28 = smov 128   ;;  %s535_s29 = smov 8  }
  0x12   :  { %36 = dma.hbm_to_vmem [thread:$0]  %s645_s1, 2048, %s31_s19, [#allocation6], %s534_s28, %s534_s28, %s535_s29  }
  0x13   :  { %s536_s7 = smov [#allocation2]   ;;  %s461_s11 = scalar_lea.hbm %s644_s0, 128 }
  0x14   :  { %s18_s8 = sshll.u32 %s536_s7, 4  ;;  %p462_p8 = scmp.ne.s32.totalorder %s644_s0, %s461_s11  ;;  %s19_s8 = int_to_ptr.vmem [resolvable:$true] %s18_s8 }
  0x15   :  { %p465_p9 = scmp.lt.u32.totalorder %s461_s11, %s644_s0 }
  0x17   :  { %p467_p10 = pnand %p465_p9, %p462_p8 }
  0x19   :  { %470 = shalt.err (!%p467_p10)
}
  0x1a   :  { %s471_s16 = scalar_lea.vmem %s19_s8, 128  ;;  %p476_p12 = scmp.lt.s32.totalorder %s19_s8, %s19_s8 }
  0x1b   :  { %p472_p11 = scmp.ne.s32.totalorder %s19_s8, %s471_s16  ;;  %p477_p13 = scmp.lt.s32.totalorder %s471_s16, %s471_s16 }
  0x1d   :  { %p478_p0 = por %p477_p13, %p476_p12 }
  0x1f   :  { %p479_p1 = pnand %p478_p0, %p472_p11 }
  0x21   :  { %482 = shalt.err (!%p479_p1)
}
  0x22   :  { %s537_s1 = smov 64   ;;  %s538_s17 = smov 4  }
  0x23   :  { %24 = dma.hbm_to_vmem [thread:$0]  %s644_s0, 128, %s19_s8, [#allocation3], %s537_s1, %s537_s1, %s538_s17  }
  0x24   :  { %s539_s20 = smov [#allocation7]   ;;  %s483_s24 = scalar_lea.hbm %s647_s3, 512 }
  0x25   :  { %s44_s21 = sshll.u32 %s539_s20, 4  ;;  %p484_p2 = scmp.ne.s32.totalorder %s647_s3, %s483_s24  ;;  %s45_s21 = int_to_ptr.vmem [resolvable:$true] %s44_s21 }
  0x26   :  { %p487_p3 = scmp.lt.u32.totalorder %s483_s24, %s647_s3 }
  0x28   :  { %p489_p4 = pnand %p487_p3, %p484_p2 }
  0x2a   :  { %492 = shalt.err (!%p489_p4)
}
  0x2b   :  { %s493_s6 = scalar_lea.vmem %s45_s21, 512  ;;  %p498_p6 = scmp.lt.s32.totalorder %s45_s21, %s45_s21 }
  0x2c   :  { %p494_p5 = scmp.ne.s32.totalorder %s45_s21, %s493_s6  ;;  %p499_p7 = scmp.lt.s32.totalorder %s493_s6, %s493_s6 }
  0x2e   :  { %p500_p8 = por %p499_p7, %p498_p6 }
  0x30   :  { %p501_p9 = pnand %p500_p8, %p494_p5 }
  0x32   :  { %504 = shalt.err (!%p501_p9)
}
  0x33   :  { %50 = dma.hbm_to_vmem [thread:$0]  %s647_s3, 512, %s45_s21, [#allocation6], %s534_s28, %s534_s28, %s535_s29  }
  0x34   :  { %527 = dma.done.wait [#allocation3], 128  }
  0x35   :  { %528 = vsyncadd [#allocation3], 4294967168 }
  0x36   :  { %529 = dma.done.wait [#allocation6], 2560  }
  0x37   :  { %530 = vsyncadd [#allocation6], 4294964736  ;;  %v540_v0 = vmov 0   ;;  %v414_v1 = vld [vmem:[#allocation5 + $0x4] ss:$8 sps:$4 sm:$0xff]   ;;  %v438_v17 = vld [vmem:[#allocation2] sm:$0xff]   ;;  %v83_v18 = vlaneseq }
  0x38   :  { %211 = vmatprep.mubr.bf16.mxu0 %v540_v0  ;;  %v416_v2 = vld [vmem:[#allocation5] ss:$8 sps:$4 sm:$0xff]   ;;  %179 = vmatprep.subr.bf16.mxu0 %v414_v1  ;;  %v417_v3 = vld [vmem:[#allocation5 + $0x14] ss:$8 sps:$4 sm:$0xff]   ;;  %v419_v4 = vld [vmem:[#allocation5 + $0x10] ss:$8 sps:$4 sm:$0xff]  }
  0x39   :  { %180 = vmatpush1.bf16.msra.mxu0 %v416_v2  ;;  %v420_v5 = vld [vmem:[#allocation5 + $0x24] ss:$8 sps:$4 sm:$0xff]   ;;  %v422_v6 = vld [vmem:[#allocation5 + $0x20] ss:$8 sps:$4 sm:$0xff]   ;;  %v423_v7 = vld [vmem:[#allocation5 + $0x34] ss:$8 sps:$4 sm:$0xff]  }
  0x3a   :  { %181 = vmatprep.subr.bf16.mxu0 %v417_v3  ;;  %v425_v8 = vld [vmem:[#allocation5 + $0x30] ss:$8 sps:$4 sm:$0xff]   ;;  %v426_v9 = vld [vmem:[#allocation5 + $0x44] ss:$8 sps:$4 sm:$0xff]   ;;  %v428_v10 = vld [vmem:[#allocation5 + $0x40] ss:$8 sps:$4 sm:$0xff]  }
  0x3b   :  { %v429_v11 = vld [vmem:[#allocation5 + $0x54] ss:$8 sps:$4 sm:$0xff]   ;;  %v431_v12 = vld [vmem:[#allocation5 + $0x50] ss:$8 sps:$4 sm:$0xff]   ;;  %v432_v13 = vld [vmem:[#allocation5 + $0x64] ss:$8 sps:$4 sm:$0xff]  }
  0x3c   :  { %v434_v14 = vld [vmem:[#allocation5 + $0x60] ss:$8 sps:$4 sm:$0xff]   ;;  %v435_v15 = vld [vmem:[#allocation5 + $0x74] ss:$8 sps:$4 sm:$0xff]   ;;  %v437_v16 = vld [vmem:[#allocation5 + $0x70] ss:$8 sps:$4 sm:$0xff]  }
  0x3d   :  { %182 = vmatpush1.bf16.msra.mxu0 %v419_v4  ;;  %v84_v19 = vshrl.u32 %v83_v18, 7  ;;  %v81_v21 = vld [vmem:[%s646_s2] sm:$0x3]  ;;  %v246_v35 = vld [vmem:[#allocation7] sm:$0xff]  ;;  %v247_v36 = vld [vmem:[#allocation7 + $0x8] sm:$0xff]  ;;  %s541_s2 = smov 96  }
  0x3e   :  { %183 = vmatprep.subr.bf16.mxu0 %v420_v5  ;;  %v396_v37 = vpack.c.bf16 %v247_v36, %v246_v35  ;;  %v248_v38 = vld [vmem:[#allocation7 + $0x10] sm:$0xff]  ;;  %v249_v39 = vld [vmem:[#allocation7 + $0x18] sm:$0xff]  ;;  %vm257_vm0 = vcmask 261120   ;;  %s542_s11 = smov [#allocation8]  }
  0x3f   :  { %v85_v20 = vsub.s32 0, %v84_v19  ;;  %v89_v22 = vsub.s32 1, %v84_v19  ;;  %v400_v40 = vpack.c.bf16 %v249_v39, %v248_v38  ;;  %v376_v51 = vld [vmem:[%s648_s4] ss:$0 sm:$0xff]  ;;  %s346_s12 = sshll.u32 %s542_s11, 4  ;;  %s347_s12 = int_to_ptr.vmem [resolvable:$true] %s346_s12 }
  0x40   :  { %397 = vmatprep.subr.bf16.mxu1 %v396_v37  ;;  %s505_s13 = scalar_lea.vmem %s347_s12, 256  ;;  %p510_p11 = scmp.lt.s32.totalorder %s347_s12, %s347_s12 }
  0x41   :  { %184 = vmatpush1.bf16.msra.mxu0 %v422_v6  ;;  %v86_v23 = vrot.slane %v81_v21, %v85_v20  ;;  %v90_v24 = vrot.slane %v81_v21, %v89_v22  ;;  %399 = vmatpush3.bf16.msra.mxu1 %v396_v37  ;;  %p506_p10 = scmp.ne.s32.totalorder %s347_s12, %s505_s13  ;;  %p511_p12 = scmp.lt.s32.totalorder %s505_s13, %s505_s13 }
  0x42   :  { %185 = vmatprep.subr.bf16.mxu0 %v423_v7  ;;  %401 = vmatprep.subr.bf16.mxu1 %v400_v40 }
  0x43   :  { %p512_p13 = por %p511_p12, %p510_p11 }
  0x45   :  { %186 = vmatpush1.bf16.msra.mxu0 %v425_v8  ;;  %403 = vmatpush3.bf16.msra.mxu1 %v400_v40  ;;  %p513_p0 = pnand %p512_p13, %p506_p10 }
  0x46   :  { %187 = vmatprep.subr.bf16.mxu0 %v426_v9 }
  0x49   :  { %188 = vmatpush1.bf16.msra.mxu0 %v428_v10 }
  0x4a   :  { %189 = vmatprep.subr.bf16.mxu0 %v429_v11 }
  0x4d   :  { %190 = vmatpush1.bf16.msra.mxu0 %v431_v12 }
  0x4e   :  { %191 = vmatprep.subr.bf16.mxu0 %v432_v13 }
  0x51   :  { %192 = vmatpush1.bf16.msra.mxu0 %v434_v14 }
  0x52   :  { %193 = vmatprep.subr.bf16.mxu0 %v435_v15 }
  0x55   :  { %194 = vmatpush1.bf16.msra.mxu0 %v437_v16 }
  0x58   :  { %212 = vmatmul.mubr.bf16.vlgmr.msra.gmra.mrb[0].mxu0 %v438_v17 }
 0x12b   :  { %v213_v25 = vpop.f32.mrb[0].mxu0 }
 0x12c   :  { %v214_v26 = vadd.f32 %v213_v25, %v86_v23  ;;  %v215_v27 = vpop.f32.mrb[1].mxu0 }
 0x12d   :  { %v216_v28 = vadd.f32 %v215_v27, %v90_v24  ;;  %v217_v29 = vpop.f32.mrb[2].mxu0 }
 0x12e   :  { %v218_v30 = vadd.f32 %v217_v29, %v86_v23  ;;  %v219_v31 = vpop.f32.mrb[3].mxu0 }
 0x12f   :  { %v220_v32 = vadd.f32 %v219_v31, %v90_v24  ;;  %v222_v33 = vmax.f32 %v214_v26, %v216_v28 }
 0x131   :  { %226 = vrot.lane.b32.xlu0 %v222_v33, %s537_s1  ;;  %v223_v34 = vmax.f32 %v218_v30, %v220_v32 }
 0x135   :  { %228 = vrot.lane.b32.xlu0 %v223_v34, %s537_s1 }
 0x1a3   :  { %v227_v41 = vpop.permute.xlu0 %226 }
 0x1a4   :  { %v232_v42 = vmax.f32 %v222_v33, %v227_v41 }
 0x1a6   :  { %236 = vrot.lane.b32.xlu1 %v232_v42, %s541_s2 }
 0x1a7   :  { %v229_v43 = vpop.permute.xlu0 %228 }
 0x1a8   :  { %v233_v44 = vmax.f32 %v223_v34, %v229_v43 }
 0x1aa   :  { %238 = vrot.lane.b32.xlu1 %v233_v44, %s541_s2 }
 0x218   :  { %v237_v45 = vpop.permute.xlu1 %236 }
 0x219   :  { %v242_v46 = vmax.f32 %v232_v42, %v237_v45 }
 0x21b   :  { %v244_v47 = vmax.f32 %v242_v46, 0.0 }
 0x21c   :  { %v239_v48 = vpop.permute.xlu1 %238 }
 0x21d   :  { %v243_v49 = vmax.f32 %v233_v44, %v239_v48  ;;  %393 = vmatprep.mubr.msk.f32.mxu1 %vm257_vm0, %v244_v47 }
 0x21f   :  { %v245_v50 = vmax.f32 %v243_v49, 0.0 }
 0x221   :  { %394 = vmatmul.mubr.msk.f32.vlgmr.msra.gmra.mrb[0].mxu1 %vm257_vm0, %v245_v50 }
 0x2f4   :  { %v395_v52 = vpop.f32.mrb[0].mxu1 }
 0x2f5   :  { %v336_v53 = vadd.f32 %v395_v52, %v376_v51  ;;  %v330_v54 = vpop.f32.mrb[1].mxu1 }
 0x2f6   :  { %v331_v55 = vadd.f32 %v376_v51, %v330_v54 }
 0x2f7   :  { %340 = vst.msk [vmem:[#allocation8 + $0x8] sm:$0xff] %vm257_vm0, %v336_v53 }
 0x2f8   :  { %339 = vst.msk [vmem:[#allocation8] sm:$0xff] %vm257_vm0, %v331_v55 }
 0x2f9   :  { %516 = shalt.err (!%p513_p0)
}
 0x2fa   :  { %s517_s15 = scalar_lea.hbm %s649_s5, 256 }
 0x2fb   :  { %p518_p1 = scmp.ne.s32.totalorder %s649_s5, %s517_s15  ;;  %p521_p2 = scmp.lt.u32.totalorder %s517_s15, %s649_s5 }
 0x2fd   :  { %p523_p3 = pnand %p521_p2, %p518_p1 }
 0x2ff   :  { %526 = shalt.err (!%p523_p3)
}
 0x300   :  { %352 = dma.vmem_to_hbm [thread:$0]  %s347_s12, 256, %s649_s5, [#allocation4], %s534_s28, %s534_s28, %s535_s29  }
 0x301   :  { %531 = dma.done.wait [#allocation4], 256  }
 0x302   :  { %532 = vsyncadd [#allocation4], 4294967040 }
 0x303   :  { %356 = vsyncpa [#allocation3], 1 }
 0x304   :  { %357 = vsyncpa [#allocation6], 1 }
 0x305   :  { %358 = vsyncpa [#allocation4], 1 }

</bundles_post_ra>
